<compile_context>
chip_gen: v7x
topology: tpu7x:2x2x1
jax: 0.10.0
libtpu: 0.0.40
codegen_flags: <defaults>
</compile_context>

<pallas_src>
import functools

import jax
import jax.numpy as jnp
import numpy as np
from jax.experimental import pallas as pl
from jax.experimental.pallas import tpu as pltpu


HIDDEN = 128       # hidden width of the torch module (exactly one lane tile)
TILE_B = 1024      # max batch tile (sweepable)


def _round_up(x, m):
    return ((x + m - 1) // m) * m


def _supports_bf16_eup():
    """bf16 tanh only on chips with a bf16 EUP (v6e / v7x); f32 elsewhere."""
    try:
        kind = jax.devices()[0].device_kind.lower()
    except Exception:
        return False
    return any(tag in kind for tag in ("v6", "v7", "tpu7"))


def _actor_critic_kernel(obs_ref, w1_ref, b1_ref, w2_ref, b2_ref,
                         wh_ref, bh_ref, out_ref, *, bf16_tanh):
    # base: Linear -> tanh -> Linear -> tanh, then fused (mean|value) head.
    x = obs_ref[...].astype(jnp.bfloat16)                 # (tile_b, obs_dim)
    a1 = jnp.dot(x, w1_ref[...],
                 preferred_element_type=jnp.float32) + b1_ref[...]
    if bf16_tanh:
        h = jnp.tanh(a1.astype(jnp.bfloat16))             # bf16 EUP (v6e/v7x)
    else:
        h = jnp.tanh(a1).astype(jnp.bfloat16)             # f32 EUP (v5e)
    a2 = jnp.dot(h, w2_ref[...],
                 preferred_element_type=jnp.float32) + b2_ref[...]
    if bf16_tanh:
        h2 = jnp.tanh(a2.astype(jnp.bfloat16))
    else:
        h2 = jnp.tanh(a2).astype(jnp.bfloat16)
    # fused heads: lanes [0, act_dim) = mean, lane act_dim = value
    out_ref[...] = (jnp.dot(h2, wh_ref[...],
                            preferred_element_type=jnp.float32) + bh_ref[...])


def prepare_params(params):
    """One-time weight prep (hoisted out of the per-call hot path)."""
    act_dim = params["wm"].shape[1]
    head_out = act_dim + 1
    wh = jnp.concatenate([params["wm"], params["wv"]], axis=1)   # (H, act_dim+1)
    bh = jnp.concatenate([params["bm"], params["bv"]], axis=0)
    return dict(
        w1=params["w1"].astype(jnp.bfloat16),
        b1=params["b1"].reshape(1, HIDDEN).astype(jnp.float32),
        w2=params["w2"].astype(jnp.bfloat16),
        b2=params["b2"].reshape(1, HIDDEN).astype(jnp.float32),
        wh=wh.astype(jnp.bfloat16),
        bh=bh.reshape(1, head_out).astype(jnp.float32),
        act_dim=act_dim,
        head_out=head_out,
    )


def actor_critic_forward(obs, prepared):
    """Returns (mean, value) with shapes (B, act_dim), (B, 1)."""
    B, obs_dim = obs.shape
    act_dim = prepared["act_dim"]
    head_out = prepared["head_out"]
    H = HIDDEN

    # Batch tiling: small batches -> one small tile; larger batches -> a tile
    # capped at TILE_B but chosen so the grid has >=2 "parallel" steps (both
    # v7x TensorCores).  Everything rounded to 16 rows (bf16 sublane pairs).
    Bp16 = _round_up(max(B, 16), 16)
    if Bp16 <= 32:
        tile_b = Bp16
    else:
        tile_b = min(TILE_B, _round_up(pl.cdiv(Bp16, 2), 16))
    Bp = _round_up(B, tile_b)

    obs_p = obs.astype(jnp.float32)
    if Bp != B:
        obs_p = jnp.pad(obs_p, ((0, Bp - B), (0, 0)))

    def resident(shape):  # weights/biases: constant block, VMEM-resident
        return pl.BlockSpec(shape, lambda i: (0, 0))

    kernel = functools.partial(_actor_critic_kernel,
                               bf16_tanh=_supports_bf16_eup())

    out = pl.pallas_call(
        kernel,
        out_shape=jax.ShapeDtypeStruct((Bp, head_out), jnp.float32),
        grid=(Bp // tile_b,),
        in_specs=[
            pl.BlockSpec((tile_b, obs_dim), lambda i: (i, 0)),  # obs moves
            resident((obs_dim, H)), resident((1, H)),           # w1, b1
            resident((H, H)), resident((1, H)),                 # w2, b2
            resident((H, head_out)), resident((1, head_out)),   # wh, bh
        ],
        out_specs=pl.BlockSpec((tile_b, head_out), lambda i: (i, 0)),
        compiler_params=pltpu.CompilerParams(
            dimension_semantics=("parallel",)),
    )(obs_p, prepared["w1"], prepared["b1"], prepared["w2"], prepared["b2"],
      prepared["wh"], prepared["bh"])

    mean = out[:B, :act_dim]
    value = out[:B, act_dim:act_dim + 1]
    return mean, value


def init_params(key, obs_dim, act_dim):
    """Deterministic init mimicking torch nn.Linear (uniform +/- 1/sqrt(fan_in)).

    Weights are stored transposed w.r.t. torch: (in_features, out_features)."""
    H = HIDDEN
    ks = jax.random.split(key, 8)

    def linear(kw, kb, fan_in, fan_out):
        bound = 1.0 / float(np.sqrt(fan_in))
        w = jax.random.uniform(kw, (fan_in, fan_out), jnp.float32, -bound, bound)
        b = jax.random.uniform(kb, (fan_out,), jnp.float32, -bound, bound)
        return w, b

    w1, b1 = linear(ks[0], ks[1], obs_dim, H)
    w2, b2 = linear(ks[2], ks[3], H, H)
    wm, bm = linear(ks[4], ks[5], H, act_dim)
    wv, bv = linear(ks[6], ks[7], H, 1)
    # log_std exists in the module but does not enter forward().
    log_std = jnp.zeros((act_dim,), jnp.float32)
    return dict(w1=w1, b1=b1, w2=w2, b2=b2, wm=wm, bm=bm, wv=wv, bv=bv,
                log_std=log_std)


if __name__ == "__main__":
    key = jax.random.PRNGKey(0)
    obs_dim, act_dim, batch = 23, 7, 2   # Pusher-v4 dims, small batch

    pkey, okey = jax.random.split(key)
    params = init_params(pkey, obs_dim, act_dim)
    prepared = prepare_params(params)    # one-time, reused across calls
    obs = jax.random.normal(okey, (batch, obs_dim), jnp.float32)

    mean, value = actor_critic_forward(obs, prepared)
    jax.block_until_ready((mean, value))

    # Pure-numpy f32 reference of the torch forward().
    o = np.asarray(obs)
    h = np.tanh(o @ np.asarray(params["w1"]) + np.asarray(params["b1"]))
    h = np.tanh(h @ np.asarray(params["w2"]) + np.asarray(params["b2"]))
    ref_mean = h @ np.asarray(params["wm"]) + np.asarray(params["bm"])
    ref_value = h @ np.asarray(params["wv"]) + np.asarray(params["bv"])

    assert mean.shape == (batch, act_dim) and value.shape == (batch, 1)
    # bf16 MXU operands (and bf16 tanh on v6e/v7x) -> relaxed tolerance vs f32.
    assert np.allclose(np.asarray(mean), ref_mean, atol=3e-2, rtol=3e-2)
    assert np.allclose(np.asarray(value), ref_value, atol=3e-2, rtol=3e-2)

    # TODO(synk): get_action/evaluate (Normal sample, log_prob, entropy) are
    # distribution glue outside forward(); fuse into this kernel only if the
    # tiny-batch inference path becomes a hot spot.
    print("KERNEL_OK")
</pallas_src>

<mosaic_0001>
module attributes {stable_mosaic.version = 11 : i64} {
  func.func @_actor_critic_kernel(%arg0: i32, %arg1: memref<16x23xf32, #tpu.memory_space<vmem>>, %arg2: memref<23x128xbf16, #tpu.memory_space<vmem>>, %arg3: memref<1x128xf32, #tpu.memory_space<vmem>>, %arg4: memref<128x128xbf16, #tpu.memory_space<vmem>>, %arg5: memref<1x128xf32, #tpu.memory_space<vmem>>, %arg6: memref<128x8xbf16, #tpu.memory_space<vmem>>, %arg7: memref<1x8xf32, #tpu.memory_space<vmem>>, %arg8: memref<16x8xf32, #tpu.memory_space<vmem>>) attributes {dimension_semantics = [#tpu.dimension_semantics<parallel>], iteration_bounds = array<i64: 1>, scalar_prefetch = 0 : i64, scratch_operands = 0 : i64, tpu.core_type = #tpu.core_type<tc>, window_params = [{transform_indices = @transform_0, window_bounds = array<i64: 16, 23>}, {pipeline_mode = #tpu.pipeline_mode<synchronous>, transform_indices = @transform_1, window_bounds = array<i64: 23, 128>}, {pipeline_mode = #tpu.pipeline_mode<synchronous>, transform_indices = @transform_2, window_bounds = array<i64: 1, 128>}, {pipeline_mode = #tpu.pipeline_mode<synchronous>, transform_indices = @transform_3, window_bounds = array<i64: 128, 128>}, {pipeline_mode = #tpu.pipeline_mode<synchronous>, transform_indices = @transform_4, window_bounds = array<i64: 1, 128>}, {pipeline_mode = #tpu.pipeline_mode<synchronous>, transform_indices = @transform_5, window_bounds = array<i64: 128, 8>}, {pipeline_mode = #tpu.pipeline_mode<synchronous>, transform_indices = @transform_6, window_bounds = array<i64: 1, 8>}, {transform_indices = @transform_7, window_bounds = array<i64: 16, 8>}]} {
    %c0 = arith.constant 0 : index
    %c0_0 = arith.constant 0 : index
    %0 = vector.load %arg1[%c0, %c0_0] : memref<16x23xf32, #tpu.memory_space<vmem>>, vector<16x23xf32>
    %1 = arith.truncf %0 : vector<16x23xf32> to vector<16x23xbf16>
    %c0_1 = arith.constant 0 : index
    %c0_2 = arith.constant 0 : index
    %2 = vector.load %arg2[%c0_1, %c0_2] : memref<23x128xbf16, #tpu.memory_space<vmem>>, vector<23x128xbf16>
    %cst = arith.constant dense<0.000000e+00> : vector<16x128xf32>
    %3 = tpu.matmul %1, %2, %cst {dimension_numbers = #tpu.dot_dimension_numbers<[1], [0], [0], [1], [0, 0, 1, 1], [], []>} : vector<16x23xbf16>, vector<23x128xbf16>, vector<16x128xf32> -> vector<16x128xf32>
    %c0_3 = arith.constant 0 : index
    %c0_4 = arith.constant 0 : index
    %4 = vector.load %arg3[%c0_3, %c0_4] : memref<1x128xf32, #tpu.memory_space<vmem>>, vector<1x128xf32>
    %5 = vector.broadcast %4 : vector<1x128xf32> to vector<16x128xf32>
    %6 = arith.addf %3, %5 : vector<16x128xf32>
    %7 = math.tanh %6 : vector<16x128xf32>
    %8 = arith.truncf %7 : vector<16x128xf32> to vector<16x128xbf16>
    %c0_5 = arith.constant 0 : index
    %c0_6 = arith.constant 0 : index
    %9 = vector.load %arg4[%c0_5, %c0_6] : memref<128x128xbf16, #tpu.memory_space<vmem>>, vector<128x128xbf16>
    %cst_7 = arith.constant dense<0.000000e+00> : vector<16x128xf32>
    %10 = tpu.matmul %8, %9, %cst_7 {dimension_numbers = #tpu.dot_dimension_numbers<[1], [0], [0], [1], [0, 0, 1, 1], [], []>} : vector<16x128xbf16>, vector<128x128xbf16>, vector<16x128xf32> -> vector<16x128xf32>
    %c0_8 = arith.constant 0 : index
    %c0_9 = arith.constant 0 : index
    %11 = vector.load %arg5[%c0_8, %c0_9] : memref<1x128xf32, #tpu.memory_space<vmem>>, vector<1x128xf32>
    %12 = vector.broadcast %11 : vector<1x128xf32> to vector<16x128xf32>
    %13 = arith.addf %10, %12 : vector<16x128xf32>
    %14 = math.tanh %13 : vector<16x128xf32>
    %15 = arith.truncf %14 : vector<16x128xf32> to vector<16x128xbf16>
    %c0_10 = arith.constant 0 : index
    %c0_11 = arith.constant 0 : index
    %16 = vector.load %arg6[%c0_10, %c0_11] : memref<128x8xbf16, #tpu.memory_space<vmem>>, vector<128x8xbf16>
    %cst_12 = arith.constant dense<0.000000e+00> : vector<16x8xf32>
    %17 = tpu.matmul %15, %16, %cst_12 {dimension_numbers = #tpu.dot_dimension_numbers<[1], [0], [0], [1], [0, 0, 1, 1], [], []>} : vector<16x128xbf16>, vector<128x8xbf16>, vector<16x8xf32> -> vector<16x8xf32>
    %c0_13 = arith.constant 0 : index
    %c0_14 = arith.constant 0 : index
    %18 = vector.load %arg7[%c0_13, %c0_14] : memref<1x8xf32, #tpu.memory_space<vmem>>, vector<1x8xf32>
    %19 = vector.broadcast %18 : vector<1x8xf32> to vector<16x8xf32>
    %20 = arith.addf %17, %19 : vector<16x8xf32>
    %c0_15 = arith.constant 0 : index
    %c0_16 = arith.constant 0 : index
    %21 = vector.load %arg8[%c0_15, %c0_16] : memref<16x8xf32, #tpu.memory_space<vmem>>, vector<16x8xf32>
    tpu.vector_store %arg8[%c0_15, %c0_16], %20 {strides = array<i32>} : memref<16x8xf32, #tpu.memory_space<vmem>>, vector<16x8xf32>,
    return
  }
  func.func @transform_0(%arg0: i32) -> (i32, i32) {
    %c0_i32 = arith.constant 0 : i32
    %c0_i32_0 = arith.constant 0 : i32
    return %arg0, %c0_i32 : i32, i32
  }
  func.func @transform_1(%arg0: i32) -> (i32, i32) {
    %c0_i32 = arith.constant 0 : i32
    %c0_i32_0 = arith.constant 0 : i32
    %c0_i32_1 = arith.constant 0 : i32
    return %c0_i32, %c0_i32_0 : i32, i32
  }
  func.func @transform_2(%arg0: i32) -> (i32, i32) {
    %c0_i32 = arith.constant 0 : i32
    %c0_i32_0 = arith.constant 0 : i32
    %c0_i32_1 = arith.constant 0 : i32
    return %c0_i32, %c0_i32_0 : i32, i32
  }
  func.func @transform_3(%arg0: i32) -> (i32, i32) {
    %c0_i32 = arith.constant 0 : i32
    %c0_i32_0 = arith.constant 0 : i32
    %c0_i32_1 = arith.constant 0 : i32
    return %c0_i32, %c0_i32_0 : i32, i32
  }
  func.func @transform_4(%arg0: i32) -> (i32, i32) {
    %c0_i32 = arith.constant 0 : i32
    %c0_i32_0 = arith.constant 0 : i32
    %c0_i32_1 = arith.constant 0 : i32
    return %c0_i32, %c0_i32_0 : i32, i32
  }
  func.func @transform_5(%arg0: i32) -> (i32, i32) {
    %c0_i32 = arith.constant 0 : i32
    %c0_i32_0 = arith.constant 0 : i32
    %c0_i32_1 = arith.constant 0 : i32
    return %c0_i32, %c0_i32_0 : i32, i32
  }
  func.func @transform_6(%arg0: i32) -> (i32, i32) {
    %c0_i32 = arith.constant 0 : i32
    %c0_i32_0 = arith.constant 0 : i32
    %c0_i32_1 = arith.constant 0 : i32
    return %c0_i32, %c0_i32_0 : i32, i32
  }
  func.func @transform_7(%arg0: i32) -> (i32, i32) {
    %c0_i32 = arith.constant 0 : i32
    %c0_i32_0 = arith.constant 0 : i32
    return %arg0, %c0_i32 : i32, i32
  }
}

</mosaic_0001>

<bundles_post_ra>
// kernel: tpu_custom_call.1
= control target key start
LH: loop header
LB: loop body
LE: loop exit
PB: predicated region body
PF: predicated region fallthrough
CT: control target
= control target key end

     0   :  { %12 = vsyncpa [#allocation3], 0  ;;  %s500_s24 = smov [#allocation2]   ;;  %s651_s0 = inlined_call_operand.hbm [shape: f32[16,23], index: 0, kind: input, shape index: {}]   ;;  %s652_s1 = inlined_call_operand.vmem [shape: bf16[23,128], index: 1, kind: input, shape index: {}]   ;;  %s653_s2 = inlined_call_operand.vmem [shape: f32[1,128], index: 2, kind: input, shape index: {}]   ;;  %s654_s3 = inlined_call_operand.vmem [shape: bf16[128,128], index: 3, kind: input, shape index: {}]   ;;  %s655_s4 = inlined_call_operand.vmem [shape: f32[1,128], index: 4, kind: input, shape index: {}]   ;;  %s656_s5 = inlined_call_operand.vmem [shape: bf16[128,8], index: 5, kind: input, shape index: {}]   ;;  %s657_s6 = inlined_call_operand.vmem [shape: f32[1,8], index: 6, kind: input, shape index: {}]   ;;  %s658_s7 = inlined_call_operand.vmem [shape: f32[16,8], index: 7, kind: output, shape index: {}]  }
   0x1   :  { %s18_s25 = sshll.u32 %s500_s24, 4  ;;  %s476_s28 = scalar_lea.hbm %s651_s0, 256  ;;  %s19_s25 = int_to_ptr.vmem [resolvable:$true] %s18_s25 }
   0x2   :  { %p477_p0 = scmp.ne.s32.totalorder %s651_s0, %s476_s28  ;;  %p480_p1 = scmp.lt.u32.totalorder %s476_s28, %s651_s0 }
   0x4   :  { %p482_p2 = pnand %p480_p1, %p477_p0 }
   0x6   :  { %485 = shalt.err (!%p482_p2)
}
   0x7   :  { %s486_s10 = scalar_lea.vmem %s19_s25, 256  ;;  %p491_p4 = scmp.lt.s32.totalorder %s19_s25, %s19_s25 }
   0x8   :  { %p487_p3 = scmp.ne.s32.totalorder %s19_s25, %s486_s10  ;;  %p492_p5 = scmp.lt.s32.totalorder %s486_s10, %s486_s10 }
   0xa   :  { %p493_p6 = por %p492_p5, %p491_p4 }
   0xc   :  { %p494_p7 = pnand %p493_p6, %p487_p3 }
   0xe   :  { %497 = shalt.err (!%p494_p7)
}
   0xf   :  { %s501_s11 = smov 128   ;;  %s502_s12 = smov 8  }
  0x10   :  { %24 = dma.hbm_to_vmem [thread:$0]  %s651_s0, 256, %s19_s25, [#allocation3], %s501_s11, %s501_s11, %s502_s12  }
  0x11   :  { %498 = dma.done.wait [#allocation3], 256  }
  0x12   :  { %499 = vsyncadd [#allocation3], 4294967040  ;;  %v503_v0 = vmov 0.0   ;;  %vm67_vm0 = vcmask 1042432   ;;  %vm504_vm1 = vmmov 0   ;;  %vm68_vm2 = vcmask 1043456  }
  0x13   :  { %396 = vmatprep.subr.bf16.mxu0 %v503_v0  ;;  %404 = vmatprep.subr.bf16.mxu1 %v503_v0  ;;  %v505_v1 = vmov 65535   ;;  %v450_v3 = vld [vmem:[%s652_s1] sm:$0xff]   ;;  %v451_v5 = vld [vmem:[%s652_s1 + $0x8] ss:$0 sps:$4 sm:$0xff]   ;;  %vm63_vm3 = vcmask 187392   ;;  %v454_v12 = vld [vmem:[%s654_s3 + $0x10] sm:$0xff]  }
  0x14   :  { %400 = vmatprep.mubr.msk.bf16.mxu0 %vm504_vm1, %v503_v0  ;;  %420 = vmatprep.mubr.msk.bf16.mxu1 %vm504_vm1, %v503_v0  ;;  %v69_v2 = vsel %vm67_vm0, 4294967295, %v505_v1  ;;  %v41_v6 = vld [vmem:[#allocation2] sm:$0xff]  ;;  %v42_v7 = vld [vmem:[#allocation2 + $0x8] sm:$0xff]  ;;  %v455_v13 = vld [vmem:[%s654_s3 + $0x18] sm:$0xff]   ;;  %vm345_vm4 = vcmask 64512  }
  0x15   :  { %v70_v4 = vsel %vm68_vm2, %v69_v2, 0  ;;  %397 = vmatpush3.bf16.msra.mxu0 %v450_v3  ;;  %v452_v9 = vld [vmem:[%s654_s3] sm:$0xff]   ;;  %v43_v10 = vpack.c.bf16 %v42_v7, %v41_v6  ;;  %v453_v11 = vld [vmem:[%s654_s3 + $0x8] sm:$0xff]   ;;  %v458_v16 = vld [vmem:[%s654_s3 + $0x30] sm:$0xff]  }
  0x16   :  { %398 = vmatprep.subr.bf16.mxu0 %v503_v0  ;;  %v72_v8 = vand.u32 %v451_v5, %v70_v4  ;;  %405 = vmatpush3.bf16.msra.mxu1 %v452_v9  ;;  %v456_v14 = vld [vmem:[%s654_s3 + $0x20] sm:$0xff]   ;;  %v457_v15 = vld [vmem:[%s654_s3 + $0x28] sm:$0xff]   ;;  %v459_v17 = vld [vmem:[%s654_s3 + $0x38] sm:$0xff]  }
  0x17   :  { %406 = vmatprep.subr.bf16.mxu1 %v503_v0  ;;  %v460_v18 = vld [vmem:[%s656_s5] sm:$0xff]   ;;  %v461_v19 = vld [vmem:[%s656_s5 + $0x8] sm:$0xff]   ;;  %v462_v20 = vld [vmem:[%s656_s5 + $0x10] sm:$0xff]  }
  0x18   :  { %v463_v21 = vld [vmem:[%s656_s5 + $0x18] sm:$0xff]   ;;  %v353_v22 = vld [vmem:[%s653_s2] ss:$0 sm:$0xff]  ;;  %v465_v33 = vld [vmem:[%s656_s5 + $0x28] sm:$0xff]  }
  0x19   :  { %399 = vmatpush3.bf16.msra.mxu0 %v72_v8  ;;  %v464_v32 = vld [vmem:[%s656_s5 + $0x20] sm:$0xff]   ;;  %v466_v34 = vld [vmem:[%s656_s5 + $0x30] sm:$0xff]   ;;  %v467_v35 = vld [vmem:[%s656_s5 + $0x38] sm:$0xff]  }
  0x1a   :  { %424 = vmatprep.subr.bf16.mxu0 %v503_v0  ;;  %407 = vmatpush3.bf16.msra.mxu1 %v453_v11  ;;  %v357_v36 = vld [vmem:[%s655_s4] ss:$0 sm:$0xff] }
  0x1b   :  { %408 = vmatprep.subr.bf16.mxu1 %v503_v0  ;;  %v366_v46 = vld [vmem:[%s657_s6] ss:$0 sm:$0xff] }
  0x1c   :  { %401 = vmatmul.mubr.msk.bf16.vlgmr.msra.gmra.mrb[0].mxu0 %vm63_vm3, %v43_v10 }
  0x1d   :  { %440 = vmatprep.mubr.msk.bf16.mxu0 %vm504_vm1, %v503_v0  ;;  %425 = vmatpush3.bf16.msra.mxu0 %v460_v18 }
  0x1e   :  { %409 = vmatpush3.bf16.msra.mxu1 %v454_v12  ;;  %426 = vmatprep.subr.bf16.mxu0 %v503_v0 }
  0x1f   :  { %410 = vmatprep.subr.bf16.mxu1 %v503_v0 }
  0x21   :  { %427 = vmatpush3.bf16.msra.mxu0 %v461_v19 }
  0x22   :  { %411 = vmatpush3.bf16.msra.mxu1 %v455_v13  ;;  %428 = vmatprep.subr.bf16.mxu0 %v503_v0 }
  0x23   :  { %412 = vmatprep.subr.bf16.mxu1 %v503_v0 }
  0x25   :  { %429 = vmatpush3.bf16.msra.mxu0 %v462_v20 }
  0x26   :  { %413 = vmatpush3.bf16.msra.mxu1 %v456_v14  ;;  %430 = vmatprep.subr.bf16.mxu0 %v503_v0 }
  0x27   :  { %414 = vmatprep.subr.bf16.mxu1 %v503_v0 }
  0x29   :  { %431 = vmatpush3.bf16.msra.mxu0 %v463_v21 }
  0x2a   :  { %415 = vmatpush3.bf16.msra.mxu1 %v457_v15  ;;  %432 = vmatprep.subr.bf16.mxu0 %v503_v0 }
  0x2b   :  { %416 = vmatprep.subr.bf16.mxu1 %v503_v0 }
  0x2d   :  { %433 = vmatpush3.bf16.msra.mxu0 %v464_v32 }
  0x2e   :  { %417 = vmatpush3.bf16.msra.mxu1 %v458_v16  ;;  %434 = vmatprep.subr.bf16.mxu0 %v503_v0 }
  0x2f   :  { %418 = vmatprep.subr.bf16.mxu1 %v503_v0 }
  0x31   :  { %435 = vmatpush3.bf16.msra.mxu0 %v465_v33 }
  0x32   :  { %419 = vmatpush3.bf16.msra.mxu1 %v459_v17  ;;  %436 = vmatprep.subr.bf16.mxu0 %v503_v0 }
  0x35   :  { %437 = vmatpush3.bf16.msra.mxu0 %v466_v34 }
  0x36   :  { %438 = vmatprep.subr.bf16.mxu0 %v503_v0 }
  0x39   :  { %439 = vmatpush3.bf16.msra.mxu0 %v467_v35 }
  0xef   :  { %v108_v23 = vpop.f32.mrb[0].mxu0 }
  0xf0   :  { %v109_v24 = vadd.f32 %v353_v22, %v108_v23  ;;  %v402_v25 = vpop.f32.mrb[1].mxu0 }
  0xf1   :  { %v111_v26 = vpop.f32.mrb[2].mxu0 }
  0xf2   :  { %v112_v27 = vadd.f32 %v353_v22, %v111_v26  ;;  %v403_v28 = vpop.f32.mrb[3].mxu0  ;;  %468 = vtanh.f32 %v109_v24 }
  0xf4   :  { %470 = vtanh.f32 %v112_v27 }
  0xfc   :  { %v469_v29 = vpop.eup %468 }
  0xfe   :  { %v471_v30 = vpop.eup %470 }
  0xff   :  { %v117_v31 = vpack.c.bf16 %v471_v30, %v469_v29 }
 0x101   :  { %421 = vmatmul.mubr.bf16.vlgmr.msra.gmra.mrb[0].mxu1 %v117_v31 }
 0x1d4   :  { %v223_v37 = vpop.f32.mrb[0].mxu1 }
 0x1d5   :  { %v224_v38 = vadd.f32 %v357_v36, %v223_v37  ;;  %v422_v39 = vpop.f32.mrb[1].mxu1 }
 0x1d6   :  { %v226_v40 = vpop.f32.mrb[2].mxu1 }
 0x1d7   :  { %v227_v41 = vadd.f32 %v357_v36, %v226_v40  ;;  %v423_v42 = vpop.f32.mrb[3].mxu1  ;;  %472 = vtanh.f32 %v224_v38 }
 0x1d9   :  { %474 = vtanh.f32 %v227_v41 }
 0x1e1   :  { %v473_v43 = vpop.eup %472 }
 0x1e3   :  { %v475_v44 = vpop.eup %474 }
 0x1e4   :  { %v232_v45 = vpack.c.bf16 %v475_v44, %v473_v43 }
 0x1e6   :  { %441 = vmatmul.mubr.bf16.vlgmr.msra.gmra.mrb[4].mxu0 %v232_v45 }
 0x2b9   :  { %v338_v47 = vpop.f32.mrb[4].mxu0 }
 0x2ba   :  { %v339_v48 = vadd.f32 %v366_v46, %v338_v47  ;;  %v442_v49 = vpop.f32.mrb[5].mxu0 }
 0x2bb   :  { %v341_v50 = vpop.f32.mrb[6].mxu0 }
 0x2bc   :  { %346 = vst.msk [vmem:[%s658_s7] sm:$0xff] %vm345_vm4, %v339_v48  ;;  %v342_v51 = vadd.f32 %v366_v46, %v341_v50  ;;  %v443_v52 = vpop.f32.mrb[7].mxu0 }
 0x2be   :  { %347 = vst.msk [vmem:[%s658_s7 + $0x8] sm:$0xff] %vm345_vm4, %v342_v51 }
 0x2bf   :  { %352 = vsyncpa [#allocation3], 1 }

</bundles_post_ra>
